<compile_context>
chip_gen: v5e
topology: v5e:2x2
jax: 0.10.0
libtpu: 0.0.40
codegen_flags: <defaults>
</compile_context>

<pallas_src>
import jax
import jax.numpy as jnp
from jax.experimental import pallas as pl
from jax.experimental.pallas import tpu as pltpu


def _sub_kernel(lhs_hi_ref, lhs_lo_ref, rhs_hi_ref, rhs_lo_ref, o_ref):
    # Pure scalar-unit work: two compensated-difference terms, one scalar store.
    hi_diff = lhs_hi_ref[0] - rhs_hi_ref[0]
    lo_diff = lhs_lo_ref[0] - rhs_lo_ref[0]
    o_ref[0] = hi_diff + lo_diff


def _split_hi_lo(x):
    """Split a scalar into an f32 (hi, lo) pair; lo is 0 for f32 inputs."""
    x = jnp.asarray(x)
    hi = x.astype(jnp.float32)
    if x.dtype == jnp.float64:
        lo = (x - hi.astype(jnp.float64)).astype(jnp.float32)
    else:
        lo = jnp.zeros((), jnp.float32)
    return hi.reshape(1), lo.reshape(1)


_SMEM_SPEC = pl.BlockSpec(memory_space=pltpu.MemorySpace.SMEM)


@jax.jit
def sub_float(lhs, rhs):
    """Pallas equivalent of SubFloatModule.forward(lhs, rhs) -> lhs - rhs."""
    lhs_hi, lhs_lo = _split_hi_lo(lhs)
    rhs_hi, rhs_lo = _split_hi_lo(rhs)
    out = pl.pallas_call(
        _sub_kernel,
        out_shape=jax.ShapeDtypeStruct((1,), jnp.float32),
        in_specs=[_SMEM_SPEC, _SMEM_SPEC, _SMEM_SPEC, _SMEM_SPEC],
        out_specs=_SMEM_SPEC,
        cost_estimate=pl.CostEstimate(flops=3, transcendentals=0,
                                      bytes_accessed=20),
    )(lhs_hi, lhs_lo, rhs_hi, rhs_lo)
    return out[0]


if __name__ == "__main__":
    key = jax.random.PRNGKey(0)
    k_lhs, k_rhs = jax.random.split(key)
    # 0-d scalar inputs, matching the module's annotated ([], float64) args
    # (represented as f32 scalars under the default JAX config; genuine f64
    # inputs are handled via the hi/lo compensated path when x64 is enabled).
    lhs = jax.random.normal(k_lhs, (), dtype=jnp.float32) * 3.0
    rhs = jax.random.normal(k_rhs, (), dtype=jnp.float32) * 3.0

    result = sub_float(lhs, rhs)
    jax.block_until_ready(result)

    expected = jnp.float32(lhs) - jnp.float32(rhs)
    assert jnp.allclose(result, expected, rtol=1e-6, atol=1e-6), (
        f"mismatch: {result} vs {expected}"
    )
    print("KERNEL_OK")
</pallas_src>

<mosaic_0001>
module attributes {stable_mosaic.version = 11 : i64} {
  func.func @_sub_kernel(%arg0: memref<1xf32, #tpu.memory_space<smem>>, %arg1: memref<1xf32, #tpu.memory_space<smem>>, %arg2: memref<1xf32, #tpu.memory_space<smem>>, %arg3: memref<1xf32, #tpu.memory_space<smem>>, %arg4: memref<1xf32, #tpu.memory_space<smem>>) attributes {dimension_semantics = [], scalar_prefetch = 0 : i64, scratch_operands = 0 : i64, tpu.core_type = #tpu.core_type<tc>} {
    %c0 = arith.constant 0 : index
    %0 = memref.load %arg0[%c0] : memref<1xf32, #tpu.memory_space<smem>>
    %c0_0 = arith.constant 0 : index
    %1 = memref.load %arg2[%c0_0] : memref<1xf32, #tpu.memory_space<smem>>
    %2 = arith.subf %0, %1 : f32
    %c0_1 = arith.constant 0 : index
    %3 = memref.load %arg1[%c0_1] : memref<1xf32, #tpu.memory_space<smem>>
    %c0_2 = arith.constant 0 : index
    %4 = memref.load %arg3[%c0_2] : memref<1xf32, #tpu.memory_space<smem>>
    %5 = arith.subf %3, %4 : f32
    %6 = arith.addf %2, %5 : f32
    %c0_3 = arith.constant 0 : index
    %7 = memref.load %arg4[%c0_3] : memref<1xf32, #tpu.memory_space<smem>>
    memref.store %6, %arg4[%c0_3] : memref<1xf32, #tpu.memory_space<smem>>
    return
  }
}

</mosaic_0001>

<bundles_post_ra>
// kernel: sub_float.1
= control target key start
LH: loop header
LB: loop body
LE: loop exit
PB: predicated region body
PF: predicated region fallthrough
CT: control target
= control target key end

     0   :  { %13 = vsyncpa [#allocation7], 0  ;;  %s61_s29 = smov [#allocation6]   ;;  %s102_s0 = inlined_call_operand.<no memory space> [shape: f32[1], index: 0, kind: input, shape index: {}]   ;;  %s103_s1 = inlined_call_operand.<no memory space> [shape: f32[1], index: 1, kind: input, shape index: {}, may-alias: {1,3}]   ;;  %s104_s2 = inlined_call_operand.<no memory space> [shape: f32[1], index: 2, kind: input, shape index: {}]   ;;  %s105_s3 = inlined_call_operand.<no memory space> [shape: f32[1], index: 3, kind: input, shape index: {}, may-alias: {1,3}]   ;;  %s106_s4 = inlined_call_operand.hbm [shape: f32[1], index: 4, kind: output, shape index: {}]  }
   0x1   :  { %s24_s19 = ssub.f32 %s102_s0, %s104_s2  ;;  %s36_s22 = sshll.u32 %s106_s4, 4  ;;  %s37_s22 = int_to_ptr.hbm [resolvable:$true] %s36_s22 }
   0x2   :  { %s27_s27 = ssub.f32 %s103_s1, %s105_s3 }
   0x4   :  { %s28_s28 = sadd.f32 %s27_s27, %s24_s19 }
   0x6   :  { %30 = sst [smem:[#allocation6]] %s28_s28 }
   0x7   :  { %39 = dma.smem_to_hbm %s61_s29, 16, %s37_s22, [#allocation7]  }
   0x8   :  { %59 = dma.done.wait [#allocation7], 16  }
   0x9   :  { %60 = vsyncadd [#allocation7], 4294967280 }
   0xa   :  { %44 = sfence }
   0xb   :  { %45 = vsyncpa [#allocation7], 1 }

</bundles_post_ra>
